<compile_context>
chip_gen: v7x
topology: tpu7x:2x2x1
jax: 0.10.0
libtpu: 0.0.40
codegen_flags: <defaults>
</compile_context>

<pallas_src>
import functools

import jax
import jax.numpy as jnp
from jax.experimental import pallas as pl
from jax.experimental.pallas import tpu as pltpu


def ddpm_schedules(beta1, beta2, T):
    """JAX port of the reference schedule computation (glue, not hot path)."""
    assert beta1 < beta2 < 1.0, "beta1 and beta2 must be in (0, 1)"
    beta_t = (beta2 - beta1) * jnp.arange(0, T + 1, dtype=jnp.float32) / T + beta1
    sqrt_beta_t = jnp.sqrt(beta_t)
    alpha_t = 1.0 - beta_t
    log_alpha_t = jnp.log(alpha_t)
    alphabar_t = jnp.exp(jnp.cumsum(log_alpha_t, axis=0))
    sqrtab = jnp.sqrt(alphabar_t)
    oneover_sqrta = 1.0 / jnp.sqrt(alpha_t)
    sqrtmab = jnp.sqrt(1.0 - alphabar_t)
    mab_over_sqrtmab_inv = (1.0 - alpha_t) / sqrtmab
    return {
        "alpha_t": alpha_t,
        "oneover_sqrta": oneover_sqrta,
        "sqrt_beta_t": sqrt_beta_t,
        "alphabar_t": alphabar_t,
        "sqrtab": sqrtab,
        "sqrtmab": sqrtmab,
        "mab_over_sqrtmab": mab_over_sqrtmab_inv,
    }


def _ddpm_mse_kernel(sa_ref, sb_ref,                    # (B*C, 1) per-row scales
                     x_ref, noise_ref,                  # (B*C, tn) lane chunks
                     w1bd_ref, bias1_ref, w2bd_ref, b2_ref,  # block-diag params
                     psum_ref,                          # (1, 1, 1) partial SSE
                     *, hw_valid, tn):
    x = x_ref[...]                                      # (B*C, tn) f32
    noise = noise_ref[...]                              # (B*C, tn) f32

    # Forward diffusion: x_t = sqrtab[t_b] * x + sqrtmab[t_b] * noise (f32,
    # full 8-sublane slab, per-row scale columns broadcast along lanes).
    x_t = sa_ref[...] * x + sb_ref[...] * noise

    # Synthetic eps-model (time-conditioned per-pixel MLP == 1x1 conv) for ALL
    # batch elements at once via block-diagonal weights; bf16 MXU operands,
    # f32 accumulation, lane-dense outputs.
    h = jnp.dot(w1bd_ref[...], x_t.astype(jnp.bfloat16),
                preferred_element_type=jnp.float32)            # (B*Hd, tn)
    h = jnp.maximum(h + bias1_ref[...], 0.0)                   # fused time bias
    eps = jnp.dot(w2bd_ref[...], h.astype(jnp.bfloat16),
                  preferred_element_type=jnp.float32) + b2_ref[...]  # (B*C, tn)

    d = eps - noise
    sq = d * d
    if hw_valid is not None:
        # Mask zero-padded pixel columns out of the squared error.
        col = pl.program_id(0) * tn + jax.lax.broadcasted_iota(jnp.int32, sq.shape, 1)
        sq = jnp.where(col < hw_valid, sq, 0.0)

    # One full reduce per grid step into this step's own partial-sum slot.
    psum_ref[...] = jnp.full((1, 1, 1), jnp.sum(sq), dtype=jnp.float32)


def _plan_lane_tiling(hw, max_chunk=512):
    """Pad hw to a multiple of 128; choose the largest lane chunk tn that is a
    multiple of 128, divides the padded extent, is <= max_chunk, and (when
    possible) <= hw_pad // 2 so the parallel grid has >= 2 steps (v7x 2-TC)."""
    hw_pad = ((hw + 127) // 128) * 128
    cap = min(max_chunk, hw_pad // 2) if hw_pad >= 256 else hw_pad
    cap = max(cap, 128)
    tn = 128
    for cand in range(128, cap + 1, 128):
        if hw_pad % cand == 0:
            tn = cand
    return hw_pad, tn


def ddpm_forward(x_nchw, noise_nchw, ts, schedules, params, n_T):
    """Computes MSE(noise, nn_model(sqrtab[ts]*x + sqrtmab[ts]*noise, ts/n_T))."""
    B, C, H, W = x_nchw.shape
    HW = H * W
    BC = B * C

    hw_pad, tn = _plan_lane_tiling(HW)
    n_chunks = hw_pad // tn

    # Free (contiguous) reshape NCHW -> (B*C, HW): pixels on lanes, batch*channel
    # on sublanes (8 rows for the demo shape -> full vreg sublane utilization).
    x_cm = x_nchw.reshape(BC, HW)
    n_cm = noise_nchw.reshape(BC, HW)
    if hw_pad != HW:
        pad = ((0, 0), (0, hw_pad - HW))
        x_cm = jnp.pad(x_cm, pad)
        n_cm = jnp.pad(n_cm, pad)

    # Per-row (batch*channel) diffusion scale columns.
    sa = schedules["sqrtab"][ts].astype(jnp.float32)            # (B,)
    sb = schedules["sqrtmab"][ts].astype(jnp.float32)           # (B,)
    sa_col = jnp.repeat(sa, C).reshape(BC, 1)
    sb_col = jnp.repeat(sb, C).reshape(BC, 1)

    w1, b1, wt, w2, b2 = params
    Hd = w1.shape[1]
    BHd = B * Hd

    # Block-diagonal weights (one tiny build in the wrapper) + fused time bias.
    w1bd = jnp.kron(jnp.eye(B, dtype=jnp.float32), w1.T).astype(jnp.bfloat16)  # (B*Hd, B*C)
    w2bd = jnp.kron(jnp.eye(B, dtype=jnp.float32), w2.T).astype(jnp.bfloat16)  # (B*C, B*Hd)
    tvec = ts.astype(jnp.float32) / float(n_T)                                 # (B,)
    bias1 = (b1.reshape(1, Hd) + tvec[:, None] * wt.reshape(1, Hd)).reshape(BHd, 1)
    b2bd = jnp.tile(b2.reshape(1, C), (B, 1)).reshape(BC, 1)

    kernel = functools.partial(
        _ddpm_mse_kernel,
        hw_valid=(HW if hw_pad != HW else None),
        tn=tn,
    )

    partials = pl.pallas_call(
        kernel,
        out_shape=jax.ShapeDtypeStruct((n_chunks, 1, 1), jnp.float32),
        grid_spec=pltpu.PrefetchScalarGridSpec(
            num_scalar_prefetch=0,
            grid=(n_chunks,),
            in_specs=[
                pl.BlockSpec((BC, 1), lambda i: (0, 0)),       # sqrtab per row
                pl.BlockSpec((BC, 1), lambda i: (0, 0)),       # sqrtmab per row
                pl.BlockSpec((BC, tn), lambda i: (0, i)),      # x     (lane chunk)
                pl.BlockSpec((BC, tn), lambda i: (0, i)),      # noise (lane chunk)
                pl.BlockSpec((BHd, BC), lambda i: (0, 0)),     # W1 block-diag (bf16)
                pl.BlockSpec((BHd, 1), lambda i: (0, 0)),      # fused time bias
                pl.BlockSpec((BC, BHd), lambda i: (0, 0)),     # W2 block-diag (bf16)
                pl.BlockSpec((BC, 1), lambda i: (0, 0)),       # b2 column
            ],
            out_specs=pl.BlockSpec((1, 1, 1), lambda i: (i, 0, 0)),  # partial SSE
        ),
        compiler_params=pltpu.CompilerParams(
            dimension_semantics=("parallel",)),                       # v7x 2-TC safe
    )(sa_col, sb_col, x_cm, n_cm, w1bd, bias1, w2bd, b2bd)

    # Tiny finalize outside the kernel (n_chunks scalars).
    return jnp.sum(partials) / float(B * C * H * W)


if __name__ == "__main__":
    key = jax.random.PRNGKey(0)
    B, C, H, W = 2, 4, 16, 16
    Hd = 32
    n_T = 400
    betas = (1e-4, 0.02)

    k_x, k_t, k_n, k_w1, k_b1, k_wt, k_w2, k_b2 = jax.random.split(key, 8)

    # Inputs / randomness of the forward pass (torch.randint / torch.randn_like
    # reproduced deterministically with jax.random in glue).
    x = jax.random.normal(k_x, (B, C, H, W), jnp.float32)
    ts = jax.random.randint(k_t, (B,), 1, n_T + 1)
    noise = jax.random.normal(k_n, (B, C, H, W), jnp.float32)

    # Deterministic synthetic nn_model parameters.
    w1 = jax.random.normal(k_w1, (C, Hd), jnp.float32) * 0.1
    b1 = jax.random.normal(k_b1, (1, Hd), jnp.float32) * 0.1
    wt = jax.random.normal(k_wt, (1, Hd), jnp.float32) * 0.1
    w2 = jax.random.normal(k_w2, (Hd, C), jnp.float32) * 0.1
    b2 = jax.random.normal(k_b2, (1, C), jnp.float32) * 0.1
    params = (w1, b1, wt, w2, b2)

    scheds = ddpm_schedules(betas[0], betas[1], n_T)

    loss = ddpm_forward(x, noise, ts, scheds, params, n_T)
    loss = jax.block_until_ready(loss)

    # Pure-JAX f32 reference for correctness (kernel matmuls are bf16 -> looser tol).
    sa4 = scheds["sqrtab"][ts][:, None, None, None]
    sb4 = scheds["sqrtmab"][ts][:, None, None, None]
    x_t = sa4 * x + sb4 * noise
    tok = jnp.transpose(x_t, (0, 2, 3, 1)).reshape(B * H * W, C)
    tvec = jnp.repeat(ts.astype(jnp.float32) / n_T, H * W)[:, None]
    h = jnp.maximum(tok @ w1 + b1 + tvec * wt, 0.0)
    eps = h @ w2 + b2
    noise_tok = jnp.transpose(noise, (0, 2, 3, 1)).reshape(B * H * W, C)
    ref = jnp.mean((eps - noise_tok) ** 2)

    assert jnp.allclose(loss, ref, rtol=1e-2, atol=1e-3), (float(loss), float(ref))
    print("KERNEL_OK")
</pallas_src>

<mosaic_0001>
module attributes {stable_mosaic.version = 11 : i64} {
  func.func @_ddpm_mse_kernel(%arg0: i32, %arg1: memref<8x1xf32, #tpu.memory_space<vmem>>, %arg2: memref<8x1xf32, #tpu.memory_space<vmem>>, %arg3: memref<8x128xf32, #tpu.memory_space<vmem>>, %arg4: memref<8x128xf32, #tpu.memory_space<vmem>>, %arg5: memref<64x8xbf16, #tpu.memory_space<vmem>>, %arg6: memref<64x1xf32, #tpu.memory_space<vmem>>, %arg7: memref<8x64xbf16, #tpu.memory_space<vmem>>, %arg8: memref<8x1xf32, #tpu.memory_space<vmem>>, %arg9: memref<1x1x1xf32, #tpu.memory_space<vmem>>) attributes {dimension_semantics = [#tpu.dimension_semantics<parallel>], iteration_bounds = array<i64: 2>, scalar_prefetch = 0 : i64, scratch_operands = 0 : i64, tpu.core_type = #tpu.core_type<tc>, window_params = [{pipeline_mode = #tpu.pipeline_mode<synchronous>, transform_indices = @transform_0, window_bounds = array<i64: 8, 1>}, {pipeline_mode = #tpu.pipeline_mode<synchronous>, transform_indices = @transform_1, window_bounds = array<i64: 8, 1>}, {transform_indices = @transform_2, window_bounds = array<i64: 8, 128>}, {transform_indices = @transform_3, window_bounds = array<i64: 8, 128>}, {pipeline_mode = #tpu.pipeline_mode<synchronous>, transform_indices = @transform_4, window_bounds = array<i64: 64, 8>}, {pipeline_mode = #tpu.pipeline_mode<synchronous>, transform_indices = @transform_5, window_bounds = array<i64: 64, 1>}, {pipeline_mode = #tpu.pipeline_mode<synchronous>, transform_indices = @transform_6, window_bounds = array<i64: 8, 64>}, {pipeline_mode = #tpu.pipeline_mode<synchronous>, transform_indices = @transform_7, window_bounds = array<i64: 8, 1>}, {transform_indices = @transform_8, window_bounds = array<i64: 1, 1, 1>}]} {
    %c0 = arith.constant 0 : index
    %c0_0 = arith.constant 0 : index
    %0 = vector.load %arg3[%c0, %c0_0] : memref<8x128xf32, #tpu.memory_space<vmem>>, vector<8x128xf32>
    %c0_1 = arith.constant 0 : index
    %c0_2 = arith.constant 0 : index
    %1 = vector.load %arg4[%c0_1, %c0_2] : memref<8x128xf32, #tpu.memory_space<vmem>>, vector<8x128xf32>
    %c0_3 = arith.constant 0 : index
    %c0_4 = arith.constant 0 : index
    %2 = vector.load %arg1[%c0_3, %c0_4] : memref<8x1xf32, #tpu.memory_space<vmem>>, vector<8x1xf32>
    %3 = vector.broadcast %2 : vector<8x1xf32> to vector<8x128xf32>
    %4 = arith.mulf %3, %0 : vector<8x128xf32>
    %c0_5 = arith.constant 0 : index
    %c0_6 = arith.constant 0 : index
    %5 = vector.load %arg2[%c0_5, %c0_6] : memref<8x1xf32, #tpu.memory_space<vmem>>, vector<8x1xf32>
    %6 = vector.broadcast %5 : vector<8x1xf32> to vector<8x128xf32>
    %7 = arith.mulf %6, %1 : vector<8x128xf32>
    %8 = arith.addf %4, %7 : vector<8x128xf32>
    %c0_7 = arith.constant 0 : index
    %c0_8 = arith.constant 0 : index
    %9 = vector.load %arg5[%c0_7, %c0_8] : memref<64x8xbf16, #tpu.memory_space<vmem>>, vector<64x8xbf16>
    %10 = arith.truncf %8 : vector<8x128xf32> to vector<8x128xbf16>
    %cst = arith.constant dense<0.000000e+00> : vector<64x128xf32>
    %11 = tpu.matmul %9, %10, %cst {dimension_numbers = #tpu.dot_dimension_numbers<[1], [0], [0], [1], [0, 0, 1, 1], [], []>} : vector<64x8xbf16>, vector<8x128xbf16>, vector<64x128xf32> -> vector<64x128xf32>
    %c0_9 = arith.constant 0 : index
    %c0_10 = arith.constant 0 : index
    %12 = vector.load %arg6[%c0_9, %c0_10] : memref<64x1xf32, #tpu.memory_space<vmem>>, vector<64x1xf32>
    %13 = vector.broadcast %12 : vector<64x1xf32> to vector<64x128xf32>
    %14 = arith.addf %11, %13 : vector<64x128xf32>
    %cst_11 = arith.constant 0.000000e+00 : f32
    %15 = vector.broadcast %cst_11 : f32 to vector<64x128xf32>
    %16 = arith.maximumf %14, %15 : vector<64x128xf32>
    %c0_12 = arith.constant 0 : index
    %c0_13 = arith.constant 0 : index
    %17 = vector.load %arg7[%c0_12, %c0_13] : memref<8x64xbf16, #tpu.memory_space<vmem>>, vector<8x64xbf16>
    %18 = arith.truncf %16 : vector<64x128xf32> to vector<64x128xbf16>
    %cst_14 = arith.constant dense<0.000000e+00> : vector<8x128xf32>
    %19 = tpu.matmul %17, %18, %cst_14 {dimension_numbers = #tpu.dot_dimension_numbers<[1], [0], [0], [1], [0, 0, 1, 1], [], []>} : vector<8x64xbf16>, vector<64x128xbf16>, vector<8x128xf32> -> vector<8x128xf32>
    %c0_15 = arith.constant 0 : index
    %c0_16 = arith.constant 0 : index
    %20 = vector.load %arg8[%c0_15, %c0_16] : memref<8x1xf32, #tpu.memory_space<vmem>>, vector<8x1xf32>
    %21 = vector.broadcast %20 : vector<8x1xf32> to vector<8x128xf32>
    %22 = arith.addf %19, %21 : vector<8x128xf32>
    %23 = arith.subf %22, %1 : vector<8x128xf32>
    %24 = arith.mulf %23, %23 : vector<8x128xf32>
    %25 = vector.shape_cast %24 : vector<8x128xf32> to vector<1x8x128xf32>
    %cst_17 = arith.constant dense<0.000000e+00> : vector<1xf32>
    %26 = vector.multi_reduction <add>, %25, %cst_17 [1, 2] : vector<1x8x128xf32> to vector<1xf32>
    %27 = vector.shape_cast %26 : vector<1xf32> to vector<1x1x1xf32>
    %28 = vector.extract %27[0, 0, 0] : f32 from vector<1x1x1xf32>
    %29 = vector.broadcast %28 : f32 to vector<1x1x1xf32>
    %c0_18 = arith.constant 0 : index
    %c0_19 = arith.constant 0 : index
    %c0_20 = arith.constant 0 : index
    %30 = vector.load %arg9[%c0_18, %c0_19, %c0_20] : memref<1x1x1xf32, #tpu.memory_space<vmem>>, vector<1x1x1xf32>
    tpu.vector_store %arg9[%c0_18, %c0_19, %c0_20], %29 {strides = array<i32>} : memref<1x1x1xf32, #tpu.memory_space<vmem>>, vector<1x1x1xf32>,
    return
  }
  func.func @transform_0(%arg0: i32) -> (i32, i32) {
    %c0_i32 = arith.constant 0 : i32
    %c0_i32_0 = arith.constant 0 : i32
    %c0_i32_1 = arith.constant 0 : i32
    return %c0_i32, %c0_i32_0 : i32, i32
  }
  func.func @transform_1(%arg0: i32) -> (i32, i32) {
    %c0_i32 = arith.constant 0 : i32
    %c0_i32_0 = arith.constant 0 : i32
    %c0_i32_1 = arith.constant 0 : i32
    return %c0_i32, %c0_i32_0 : i32, i32
  }
  func.func @transform_2(%arg0: i32) -> (i32, i32) {
    %c0_i32 = arith.constant 0 : i32
    %c0_i32_0 = arith.constant 0 : i32
    return %c0_i32, %arg0 : i32, i32
  }
  func.func @transform_3(%arg0: i32) -> (i32, i32) {
    %c0_i32 = arith.constant 0 : i32
    %c0_i32_0 = arith.constant 0 : i32
    return %c0_i32, %arg0 : i32, i32
  }
  func.func @transform_4(%arg0: i32) -> (i32, i32) {
    %c0_i32 = arith.constant 0 : i32
    %c0_i32_0 = arith.constant 0 : i32
    %c0_i32_1 = arith.constant 0 : i32
    return %c0_i32, %c0_i32_0 : i32, i32
  }
  func.func @transform_5(%arg0: i32) -> (i32, i32) {
    %c0_i32 = arith.constant 0 : i32
    %c0_i32_0 = arith.constant 0 : i32
    %c0_i32_1 = arith.constant 0 : i32
    return %c0_i32, %c0_i32_0 : i32, i32
  }
  func.func @transform_6(%arg0: i32) -> (i32, i32) {
    %c0_i32 = arith.constant 0 : i32
    %c0_i32_0 = arith.constant 0 : i32
    %c0_i32_1 = arith.constant 0 : i32
    return %c0_i32, %c0_i32_0 : i32, i32
  }
  func.func @transform_7(%arg0: i32) -> (i32, i32) {
    %c0_i32 = arith.constant 0 : i32
    %c0_i32_0 = arith.constant 0 : i32
    %c0_i32_1 = arith.constant 0 : i32
    return %c0_i32, %c0_i32_0 : i32, i32
  }
  func.func @transform_8(%arg0: i32) -> (i32, i32, i32) {
    %c0_i32 = arith.constant 0 : i32
    %c0_i32_0 = arith.constant 0 : i32
    %c0_i32_1 = arith.constant 0 : i32
    return %arg0, %c0_i32, %c0_i32_0 : i32, i32, i32
  }
}

</mosaic_0001>

<bundles_post_ra>
// kernel: tpu_custom_call.1
= control target key start
LH: loop header
LB: loop body
LE: loop exit
PB: predicated region body
PF: predicated region fallthrough
CT: control target
= control target key end

     0   :  { %s755_s27 = smov 0   ;;  %s839_s0 = inlined_call_operand.vmem [shape: f32[8,1], index: 0, kind: input, shape index: {}]   ;;  %s840_s1 = inlined_call_operand.vmem [shape: f32[8,1], index: 1, kind: input, shape index: {}]   ;;  %s841_s2 = inlined_call_operand.vmem [shape: f32[8,256], index: 2, kind: input, shape index: {}]   ;;  %s842_s3 = inlined_call_operand.vmem [shape: f32[8,256], index: 3, kind: input, shape index: {}]   ;;  %s843_s4 = inlined_call_operand.vmem [shape: bf16[64,8], index: 4, kind: input, shape index: {}]   ;;  %s844_s5 = inlined_call_operand.vmem [shape: f32[64,1], index: 5, kind: input, shape index: {}]   ;;  %s845_s6 = inlined_call_operand.vmem [shape: bf16[8,64], index: 6, kind: input, shape index: {}]   ;;  %s846_s7 = inlined_call_operand.vmem [shape: f32[8,1], index: 7, kind: input, shape index: {}]   ;;  %s847_s8 = inlined_call_operand.vmem [shape: f32[2,1,1], index: 8, kind: output, shape index: {}]  }
   0x1 LB: > { %s629_s28 = sadd.s32 4294967295, %s705_s27   ;;  %p633_p0 = scmp.ge.s32.totalorder %s705_s27, 1  ;;  %s705_s27 = sphi %s755_s27, %s18_s27  }
   0x2   : > { %p270_p1 = scmp.lt.s32.totalorder %s705_s27, 3 }
   0x4   : > { %p271_p2 = pnand %p633_p0, %p270_p1 }
   0x5   : > { %v319_v0 = vld [vmem:[%s839_s0] sm:$0xff] (!%p271_p2)  ;;  %v707_v1 = vmov (!%p271_p2), 0   ;;  %v345_v3 = vld [vmem:[%s844_s5 + $0x10] sm:$0xff] (!%p271_p2)  ;;  %vm411_vm0 = vcmask (!%p271_p2), 64512   ;;  %v344_v9 = vld [vmem:[%s844_s5 + $0x8] sm:$0xff] (!%p271_p2)  ;;  %p305_p3 = scmp.lt.s32.totalorder (!%p271_p2), %s629_s28, 1 }
   0x6   : > { %274 = sbr.rel (%p271_p2) target bundleno = 809 (0x329), region = 52  ;;  %693 = vset.pattern.permute.xlu0 (!%p271_p2), %v707_v1  ;;  %694 = vset.pattern.permute.xlu1 (!%p271_p2), %v707_v1  ;;  %v326_v2 = vld [vmem:[%s840_s1] sm:$0xff] (!%p271_p2)  ;;  %v349_v6 = vld [vmem:[%s844_s5 + $0x30] sm:$0xff] (!%p271_p2)  ;;  %v346_v10 = vld [vmem:[%s844_s5 + $0x18] sm:$0xff] (!%p271_p2)  ;;  %vm424_vm1 = vcmask (!%p271_p2), 1043456   ;;  %v708_v25 = vmov (!%p271_p2), 0.0  }
   0x7   : > { %322 = vperm.xlu0 (!%p271_p2), %693, %v319_v0   ;;  %v347_v4 = vld [vmem:[%s844_s5 + $0x20] sm:$0xff] (!%p271_p2)  ;;  %v348_v11 = vld [vmem:[%s844_s5 + $0x28] sm:$0xff] (!%p271_p2)  ;;  %v350_v12 = vld [vmem:[%s844_s5 + $0x38] sm:$0xff] (!%p271_p2)  ;;  %667 = vmatprep.subr.bf16.mxu1 (!%p271_p2), %v708_v25  ;;  %vm709_vm2 = vmmov (!%p271_p2), 0   ;;  %vm512_vm3 = vcmask (!%p271_p2), 523264   ;;  %vm568_vm4 = vcmask (!%p271_p2), 0  }
   0x8   : > { %v695_v5 = vld [vmem:[%s843_s4] sm:$0xff] (!%p271_p2)   ;;  %v696_v22 = vld [vmem:[%s843_s4 + $0x8] sm:$0xff] (!%p271_p2)   ;;  %v697_v23 = vld [vmem:[%s843_s4 + $0x10] sm:$0xff] (!%p271_p2)   ;;  %675 = vmatprep.mubr.msk.bf16.mxu1 (!%p271_p2), %vm709_vm2, %v708_v25 }
   0x9   : > { %659 = vmatprep.mubr.msk.bf16.mxu0 (!%p271_p2), %vm411_vm0, %v695_v5  ;;  %v506_v7 = vld [vmem:[%s846_s7] sm:$0xff] (!%p271_p2)  ;;  %v698_v24 = vld [vmem:[%s843_s4 + $0x18] sm:$0xff] (!%p271_p2)  }
   0xa   : > { %v343_v8 = vld [vmem:[%s844_s5] sm:$0xff] (!%p271_p2) }
   0xb   : > { %329 = vperm.xlu0 (!%p271_p2), %693, %v326_v2   ;;  %353 = vperm.xlu1 (!%p271_p2), %694, %v343_v8   ;;  %v501_v62 = vld [vmem:[%s845_s6] sm:$0xf] (!%p271_p2) }
   0xd   : > { %s849_s28 = smov (!%p305_p3, %s629_s28), 1 }
   0xe   : > { %s634_s11 = sshll.u32 %s849_s28, 3  ;;  %s315_s30 = scalar_lea.vmem %s847_s8, %s849_s28 }
   0xf   : > { %363 = vperm.xlu0 %693, %v345_v3   ;;  %358 = vperm.xlu1 %694, %v344_v9   ;;  %s308_s14 = scalar_lea.vmem %s841_s2, %s634_s11  ;;  %s312_s17 = scalar_lea.vmem %s842_s3, %s634_s11 }
  0x10   : > { %v317_v14 = vld [vmem:[%s308_s14] sm:$0xff] }
  0x11   : > { %v813_v15 = vld [vmem:[%s312_s17] sm:$0xff] }
  0x13   : > { %373 = vperm.xlu0 %693, %v347_v4   ;;  %368 = vperm.xlu1 %694, %v346_v10  }
  0x17   : > { %383 = vperm.xlu0 %693, %v349_v6   ;;  %378 = vperm.xlu1 %694, %v348_v11  }
  0x1b   : > { %509 = vperm.xlu0 %693, %v506_v7   ;;  %388 = vperm.xlu1 %694, %v350_v12  }
  0x86   : > { %v323_v13 = vpop.permute.xlu0 %322 }
  0x87   : > { %v325_v17 = vmul.f32 %v323_v13, %v317_v14 }
  0x8a   : > { %v330_v16 = vpop.permute.xlu0 %329  ;;  %v354_v26 = vpop.permute.xlu1 %353 }
  0x8b   : > { %v332_v18 = vmul.f32 %v330_v16, %v813_v15 }
  0x8d   : > { %v333_v19 = vadd.f32 %v332_v18, %v325_v17 }
  0x8e   : > { %v359_v27 = vpop.permute.xlu1 %358  ;;  %v364_v28 = vpop.permute.xlu0 %363 }
  0x8f   : > { %v342_v20 = vpack.c.bf16 %v333_v19, %v333_v19 }
  0x91   : > { %679 = vmatprep.subr.msk.bf16.mxu0 %vm424_vm1, %v342_v20  ;;  %v426_v21 = vsel %vm424_vm1, %v342_v20, 0 }
  0x92   : > { %658 = vmatpush3.bf16.msra.mxu0 %v426_v21  ;;  %v369_v29 = vpop.permute.xlu1 %368  ;;  %v374_v33 = vpop.permute.xlu0 %373 }
  0x95   : > { %660 = vmatmul.mubr.msk.bf16.vlgmr.msra.gmra.mrb[0].mxu0 %vm411_vm0, %v696_v22 }
  0x96   : > { %663 = vmatprep.mubr.msk.bf16.mxu0 %vm411_vm0, %v697_v23  ;;  %v379_v38 = vpop.permute.xlu1 %378  ;;  %v384_v45 = vpop.permute.xlu0 %383 }
  0x9a   : > { %v389_v50 = vpop.permute.xlu1 %388  ;;  %v510_v63 = vpop.permute.xlu0 %509 }
  0x9d   : > { %664 = vmatmul.mubr.msk.bf16.gmra.mrb[4].mxu0 %vm411_vm0, %v698_v24 }
 0x168   : > { %v661_v30 = vpop.f32.mrb[0].mxu0 }
 0x169   : > { %v471_v31 = vadd.f32 %v661_v30, %v364_v28  ;;  %v462_v32 = vpop.f32.mrb[1].mxu0 }
 0x16a   : > { %v463_v34 = vadd.f32 %v462_v32, %v354_v26  ;;  %v662_v35 = vpop.f32.mrb[2].mxu0 }
 0x16b   : > { %v474_v36 = vadd.f32 %v662_v35, %v369_v29  ;;  %v465_v37 = vpop.f32.mrb[3].mxu0  ;;  %v495_v40 = vmax.f32 %v471_v31, 0.0 }
 0x16c   : > { %v466_v39 = vadd.f32 %v465_v37, %v359_v27  ;;  %v493_v42 = vmax.f32 %v463_v34, 0.0 }
 0x16d   : > { %v496_v41 = vmax.f32 %v474_v36, 0.0 }
 0x16e   : > { %v494_v43 = vmax.f32 %v466_v39, 0.0 }
 0x16f   : > { %v503_v44 = vpack.c.bf16 %v496_v41, %v495_v40 }
 0x170   : > { %v665_v46 = vpop.f32.mrb[4].mxu0  ;;  %v502_v47 = vpack.c.bf16 %v494_v43, %v493_v42 }
 0x171   : > { %v487_v48 = vadd.f32 %v665_v46, %v384_v45  ;;  %v478_v49 = vpop.f32.mrb[5].mxu0 }
 0x172   : > { %v479_v51 = vadd.f32 %v478_v49, %v374_v33  ;;  %v666_v52 = vpop.f32.mrb[6].mxu0  ;;  %668 = vmatpush3.bf16.msra.mxu1 %v502_v47 }
 0x173   : > { %v490_v53 = vadd.f32 %v666_v52, %v389_v50  ;;  %v481_v54 = vpop.f32.mrb[7].mxu0  ;;  %669 = vmatprep.subr.bf16.mxu1 %v708_v25  ;;  %v499_v56 = vmax.f32 %v487_v48, 0.0 }
 0x174   : > { %v482_v55 = vadd.f32 %v481_v54, %v379_v38  ;;  %v497_v58 = vmax.f32 %v479_v51, 0.0 }
 0x175   : > { %v500_v57 = vmax.f32 %v490_v53, 0.0 }
 0x176   : > { %v498_v59 = vmax.f32 %v482_v55, 0.0  ;;  %670 = vmatpush3.bf16.msra.mxu1 %v503_v44 }
 0x177   : > { %v505_v60 = vpack.c.bf16 %v500_v57, %v499_v56  ;;  %671 = vmatprep.subr.bf16.mxu1 %v708_v25 }
 0x178   : > { %v504_v61 = vpack.c.bf16 %v498_v59, %v497_v58 }
 0x17a   : > { %672 = vmatpush3.bf16.msra.mxu1 %v504_v61 }
 0x17b   : > { %673 = vmatprep.subr.bf16.mxu1 %v708_v25 }
 0x17e   : > { %674 = vmatpush3.bf16.msra.mxu1 %v505_v60 }
 0x181   : > { %676 = vmatmul.mubr.msk.bf16.vlgmr.msra.gmra.mrb[0].mxu1 %vm512_vm3, %v501_v62 }
 0x254   : > { %v550_v0 = vpop.f32.mrb[0].mxu1 }
 0x255   : > { %v551_v1 = vadd.f32 %v550_v0, %v510_v63  ;;  %v677_v2 = vpop.f32.mrb[1].mxu1 }
 0x256   : > { %v553_v3 = vpop.f32.mrb[2].mxu1 }
 0x257   : > { %v678_v4 = vpop.f32.mrb[3].mxu1  ;;  %v556_v5 = vsub.f32 %v551_v1, %v813_v15 }
 0x259   : > { %v557_v6 = vmul.f32 %v556_v5, %v556_v5 }
 0x25b   : > { %558 = vadd.xlane.f32.xlu1 %v557_v6 }
 0x2e8   : > { %v559_v7 = vpop.xlane.xlu1 %558 }
 0x2e9   : > { %v560_v8 = vrot.slane %v559_v7, 4 }
 0x2eb   : > { %v561_v9 = vadd.f32 %v560_v8, %v559_v7 }
 0x2ed   : > { %v562_v10 = vrot.slane %v561_v9, 2 }
 0x2ef   : > { %v563_v11 = vadd.f32 %v562_v10, %v561_v9 }
 0x2f1   : > { %v564_v12 = vrot.slane %v563_v11, 1 }
 0x2f3   : > { %v565_v13 = vadd.f32 %v564_v12, %v563_v11 }
 0x2f5   : > { %680 = vpush %v565_v13 }
 0x326   : > { %s681_s9 = spop %680 }
 0x327   : > { %v567_v14 = vstv %s681_s9 }
 0x328   : > { %569 = vst.msk [vmem:[%s315_s30] sm:$0x1] %vm568_vm4, %v567_v14 }
 0x329 PF: > { %s18_s27 = sadd.s32 1, %s705_s27  }
 0x32a   : > { %p15_p4 = scmp.ge.s32.totalorder %s18_s27, 4  }
 0x32c   :  { %17 = sbr.rel (!%p15_p4) target bundleno = 1 (0x1), region = 85 }

</bundles_post_ra>
